<compile_context>
chip_gen: v7x
topology: tpu7x:2x2x1
jax: 0.10.0
libtpu: 0.0.40
codegen_flags: <defaults>
</compile_context>

<pallas_src>
import functools

import jax
import jax.numpy as jnp
from jax.experimental import pallas as pl
from jax.experimental.pallas import tpu as pltpu


def mlp_kernel(x_ref, w1_ref, b1_ref, w2_ref, b2_ref, w3_ref, b3_ref, o_ref):
    # Layer 1: cast activations to the weight dtype (bf16) only at the MXU
    # boundary; accumulate in f32; bias/ReLU epilogue in f32 (v5e has no bf16
    # VPU path).
    x = x_ref[...].astype(w1_ref.dtype)
    h1 = jnp.dot(x, w1_ref[...], preferred_element_type=jnp.float32)
    h1 = jnp.maximum(h1 + b1_ref[...], 0.0)
    # Layer 2 + ReLU
    h2 = jnp.dot(h1.astype(w2_ref.dtype), w2_ref[...],
                 preferred_element_type=jnp.float32)
    h2 = jnp.maximum(h2 + b2_ref[...], 0.0)
    # Layer 3 (no activation)
    out = jnp.dot(h2.astype(w3_ref.dtype), w3_ref[...],
                  preferred_element_type=jnp.float32)
    o_ref[...] = (out + b3_ref[...]).astype(o_ref.dtype)


def _round_up(n, m):
    return ((n + m - 1) // m) * m


def prepare_params(w1, b1, w2, b2, w3, b3, *, weight_dtype=jnp.bfloat16):
    """Pad hidden/output (lane) dims to multiples of 128 and cast weights to bf16.

    Call ONCE at model-load time and reuse the result for every forward pass
    (review item: hoist the padding/cast HBM round-trips out of the forward).
    Weights are stored pre-transposed as [in, out]; biases as [1, out].
    The input-feature dim (K) is deliberately left unpadded — it is only ever
    used as a full-extent block dim.
    """
    in_size, hidden = w1.shape
    out_size = w3.shape[1]
    Hp = _round_up(hidden, 128)
    Op = _round_up(out_size, 128)

    # TODO(synk): if bf16 weight bytes ever approach ~half the scoped VMEM
    # limit (very large BoW vocab / hidden), add a K/H-tiled variant with an
    # extra "arbitrary" grid axis + f32 VMEM accumulator instead of relying on
    # the fully VMEM-resident weights used here.
    w1p = jnp.zeros((in_size, Hp), weight_dtype).at[:, :hidden].set(
        w1.astype(weight_dtype))
    w2p = jnp.zeros((Hp, Hp), weight_dtype).at[:hidden, :hidden].set(
        w2.astype(weight_dtype))
    w3p = jnp.zeros((Hp, Op), weight_dtype).at[:hidden, :out_size].set(
        w3.astype(weight_dtype))
    b1p = jnp.zeros((1, Hp), jnp.float32).at[:, :hidden].set(
        b1.astype(jnp.float32))
    b2p = jnp.zeros((1, Hp), jnp.float32).at[:, :hidden].set(
        b2.astype(jnp.float32))
    b3p = jnp.zeros((1, Op), jnp.float32).at[:, :out_size].set(
        b3.astype(jnp.float32))
    return dict(w1=w1p, b1=b1p, w2=w2p, b2=b2p, w3=w3p, b3=b3p,
                out_size=out_size)


def _choose_block_b(B, max_tile):
    """Batch tile: multiple of 8 sublanes, <= max_tile rows, >= 2 tiles once
    B >= 32 (so both v7x TensorCores get work), minimal batch padding."""
    n_tiles = max(1, -(-B // max_tile))
    if B >= 32:
        n_tiles = max(n_tiles, 2)
    return _round_up(-(-B // n_tiles), 8)


@functools.lru_cache(maxsize=None)
def _build_call(B_pad, block_b, in_size, Hp, Op, out_dtype, weight_dtype,
                single_buffer_weights):
    nb = B_pad // block_b

    if single_buffer_weights:
        # Weights/biases never change across grid steps: single-buffer them to
        # halve their resident VMEM footprint (matters most on v7x's 64 MiB).
        def full(shape):
            return pl.BlockSpec(shape, lambda i: (0, 0),
                                pipeline_mode=pl.Buffered(1))
    else:
        def full(shape):
            return pl.BlockSpec(shape, lambda i: (0, 0))

    w_itemsize = jnp.dtype(weight_dtype).itemsize
    bytes_w = (in_size * Hp + Hp * Hp + Hp * Op) * w_itemsize
    bytes_b = (2 * Hp + Op) * 4
    bytes_x = B_pad * in_size * 4
    bytes_o = B_pad * Op * jnp.dtype(out_dtype).itemsize
    flops = 2 * B_pad * (in_size * Hp + Hp * Hp + Hp * Op)

    # Scoped-VMEM budget: weights + double-buffered activation tiles + f32
    # intermediates + headroom.  v5e's default scoped limit is only 16 MiB, so
    # raise it explicitly; cap at 64 MiB (v7x physical VMEM).
    vmem_needed = (bytes_w + bytes_b
                   + 2 * block_b * (in_size * 4 + Op * 4)
                   + 4 * block_b * Hp * 4
                   + (2 << 20))
    vmem_limit = int(min(max(vmem_needed, 32 << 20), 64 << 20))

    return pl.pallas_call(
        mlp_kernel,
        out_shape=jax.ShapeDtypeStruct((B_pad, Op), out_dtype),
        grid_spec=pltpu.PrefetchScalarGridSpec(
            num_scalar_prefetch=0,
            grid=(nb,),
            in_specs=[
                # x tiles: last block dim == full array dim, so K needs no
                # 128-padding; activations stream / pipeline along the batch.
                pl.BlockSpec((block_b, in_size), lambda i: (i, 0)),
                full((in_size, Hp)), full((1, Hp)),
                full((Hp, Hp)), full((1, Hp)),
                full((Hp, Op)), full((1, Op)),
            ],
            out_specs=pl.BlockSpec((block_b, Op), lambda i: (i, 0)),
        ),
        compiler_params=pltpu.CompilerParams(
            dimension_semantics=("parallel",),
            vmem_limit_bytes=vmem_limit),
        cost_estimate=pl.CostEstimate(
            flops=flops, transcendentals=0,
            bytes_accessed=bytes_x + bytes_w + bytes_b + bytes_o),
    )


_WEIGHT_SINGLE_BUFFER_OK = True  # flipped off if lowering rejects pl.Buffered(1)


def neural_net_forward(x, params, *, max_block_b=256, out_dtype=jnp.float32):
    """Forward pass.

    x: [B, input_size] f32.
    params: output of prepare_params (padded/bf16), prepared once at init.
    max_block_b: 256 default; on v6e with large batches 512 gets closer to the
      HBM roofline (keep <= 256 on v7x to respect its 64 MiB VMEM).
    out_dtype: pass jnp.bfloat16 to halve output writeback (useful on v5e) if
      the logits consumer tolerates it.
    """
    global _WEIGHT_SINGLE_BUFFER_OK
    B, in_size = x.shape
    assert in_size == params["w1"].shape[0]
    Hp = params["w2"].shape[0]
    Op = params["w3"].shape[1]
    out_size = params["out_size"]

    block_b = _choose_block_b(B, max_block_b)
    nb = -(-B // block_b)
    Bp = nb * block_b
    xp = x if Bp == B else jnp.pad(x, ((0, Bp - B), (0, 0)))

    args = (xp, params["w1"], params["b1"], params["w2"], params["b2"],
            params["w3"], params["b3"])
    weight_dtype = params["w1"].dtype

    def run(single_buffer):
        call = _build_call(Bp, block_b, in_size, Hp, Op, out_dtype,
                           weight_dtype, single_buffer)
        return call(*args)

    if _WEIGHT_SINGLE_BUFFER_OK:
        try:
            out_padded = run(True)
        except Exception:  # pragma: no cover - lowering without Buffered(1)
            _WEIGHT_SINGLE_BUFFER_OK = False
            out_padded = run(False)
    else:
        out_padded = run(False)

    # Strip batch / lane padding outside the kernel (in-kernel stores stay
    # lane-dense / unmasked).
    return out_padded[:B, :out_size]


def init_params(key, input_size, hidden_size, output_size):
    """Deterministic init mimicking PyTorch Linear default (U[-1/sqrt(fan_in), +1/sqrt(fan_in)])."""
    ks = jax.random.split(key, 6)

    def linear(kw, kb, fan_in, fan_out):
        bound = 1.0 / jnp.sqrt(fan_in)
        # stored as [in, out] (i.e. W.T of PyTorch's [out, in])
        w = jax.random.uniform(kw, (fan_in, fan_out), jnp.float32, -bound, bound)
        b = jax.random.uniform(kb, (1, fan_out), jnp.float32, -bound, bound)
        return w, b

    w1, b1 = linear(ks[0], ks[1], input_size, hidden_size)
    w2, b2 = linear(ks[2], ks[3], hidden_size, hidden_size)
    w3, b3 = linear(ks[4], ks[5], hidden_size, output_size)
    return w1, b1, w2, b2, w3, b3


if __name__ == "__main__":
    # Small synthetic sizes consistent with the bag-of-words chatbot MLP.
    batch = 8
    input_size = 64
    hidden_size = 32
    output_size = 16

    key = jax.random.PRNGKey(0)
    k_x, k_p = jax.random.split(key)
    x = jax.random.normal(k_x, (batch, input_size), dtype=jnp.float32)
    raw = init_params(k_p, input_size, hidden_size, output_size)

    # Pad + cast weights ONCE (hoisted out of the per-call path).
    params = prepare_params(*raw)

    out = neural_net_forward(x, params)
    out = jax.block_until_ready(out)
    assert out.shape == (batch, output_size)
    assert out.dtype == jnp.float32

    # Pure-JAX reference with the same bf16-matmul / f32-accumulate math.
    w1, b1, w2, b2, w3, b3 = raw
    bf = jnp.bfloat16
    ref = jnp.maximum(
        jnp.dot(x.astype(bf), w1.astype(bf),
                preferred_element_type=jnp.float32) + b1, 0.0)
    ref = jnp.maximum(
        jnp.dot(ref.astype(bf), w2.astype(bf),
                preferred_element_type=jnp.float32) + b2, 0.0)
    ref = jnp.dot(ref.astype(bf), w3.astype(bf),
                  preferred_element_type=jnp.float32) + b3
    assert jnp.allclose(out, ref, atol=1e-2, rtol=1e-2)

    # Loose sanity check against full-f32 math too.
    ref32 = jnp.maximum(x @ w1 + b1, 0.0)
    ref32 = jnp.maximum(ref32 @ w2 + b2, 0.0)
    ref32 = ref32 @ w3 + b3
    assert jnp.allclose(out, ref32, atol=5e-2, rtol=5e-2)

    print("KERNEL_OK")
</pallas_src>

<mosaic_0001>
module attributes {stable_mosaic.version = 11 : i64} {
  func.func @mlp_kernel(%arg0: i32, %arg1: memref<8x64xf32, #tpu.memory_space<vmem>>, %arg2: memref<64x128xbf16, #tpu.memory_space<vmem>>, %arg3: memref<1x128xf32, #tpu.memory_space<vmem>>, %arg4: memref<128x128xbf16, #tpu.memory_space<vmem>>, %arg5: memref<1x128xf32, #tpu.memory_space<vmem>>, %arg6: memref<128x128xbf16, #tpu.memory_space<vmem>>, %arg7: memref<1x128xf32, #tpu.memory_space<vmem>>, %arg8: memref<8x128xf32, #tpu.memory_space<vmem>>) attributes {dimension_semantics = [#tpu.dimension_semantics<parallel>], iteration_bounds = array<i64: 1>, scalar_prefetch = 0 : i64, scratch_operands = 0 : i64, tpu.core_type = #tpu.core_type<tc>, window_params = [{transform_indices = @transform_0, window_bounds = array<i64: 8, 64>}, {pipeline_mode = #tpu.pipeline_mode<synchronous>, transform_indices = @transform_1, window_bounds = array<i64: 64, 128>}, {pipeline_mode = #tpu.pipeline_mode<synchronous>, transform_indices = @transform_2, window_bounds = array<i64: 1, 128>}, {pipeline_mode = #tpu.pipeline_mode<synchronous>, transform_indices = @transform_3, window_bounds = array<i64: 128, 128>}, {pipeline_mode = #tpu.pipeline_mode<synchronous>, transform_indices = @transform_4, window_bounds = array<i64: 1, 128>}, {pipeline_mode = #tpu.pipeline_mode<synchronous>, transform_indices = @transform_5, window_bounds = array<i64: 128, 128>}, {pipeline_mode = #tpu.pipeline_mode<synchronous>, transform_indices = @transform_6, window_bounds = array<i64: 1, 128>}, {transform_indices = @transform_7, window_bounds = array<i64: 8, 128>}]} {
    %c0 = arith.constant 0 : index
    %c0_0 = arith.constant 0 : index
    %0 = vector.load %arg1[%c0, %c0_0] : memref<8x64xf32, #tpu.memory_space<vmem>>, vector<8x64xf32>
    %1 = arith.truncf %0 : vector<8x64xf32> to vector<8x64xbf16>
    %c0_1 = arith.constant 0 : index
    %c0_2 = arith.constant 0 : index
    %2 = vector.load %arg2[%c0_1, %c0_2] : memref<64x128xbf16, #tpu.memory_space<vmem>>, vector<64x128xbf16>
    %cst = arith.constant dense<0.000000e+00> : vector<8x128xf32>
    %3 = tpu.matmul %1, %2, %cst {dimension_numbers = #tpu.dot_dimension_numbers<[1], [0], [0], [1], [0, 0, 1, 1], [], []>} : vector<8x64xbf16>, vector<64x128xbf16>, vector<8x128xf32> -> vector<8x128xf32>
    %c0_3 = arith.constant 0 : index
    %c0_4 = arith.constant 0 : index
    %4 = vector.load %arg3[%c0_3, %c0_4] : memref<1x128xf32, #tpu.memory_space<vmem>>, vector<1x128xf32>
    %5 = vector.broadcast %4 : vector<1x128xf32> to vector<8x128xf32>
    %6 = arith.addf %3, %5 : vector<8x128xf32>
    %cst_5 = arith.constant 0.000000e+00 : f32
    %7 = vector.broadcast %cst_5 : f32 to vector<8x128xf32>
    %8 = arith.maximumf %6, %7 : vector<8x128xf32>
    %9 = arith.truncf %8 : vector<8x128xf32> to vector<8x128xbf16>
    %c0_6 = arith.constant 0 : index
    %c0_7 = arith.constant 0 : index
    %10 = vector.load %arg4[%c0_6, %c0_7] : memref<128x128xbf16, #tpu.memory_space<vmem>>, vector<128x128xbf16>
    %cst_8 = arith.constant dense<0.000000e+00> : vector<8x128xf32>
    %11 = tpu.matmul %9, %10, %cst_8 {dimension_numbers = #tpu.dot_dimension_numbers<[1], [0], [0], [1], [0, 0, 1, 1], [], []>} : vector<8x128xbf16>, vector<128x128xbf16>, vector<8x128xf32> -> vector<8x128xf32>
    %c0_9 = arith.constant 0 : index
    %c0_10 = arith.constant 0 : index
    %12 = vector.load %arg5[%c0_9, %c0_10] : memref<1x128xf32, #tpu.memory_space<vmem>>, vector<1x128xf32>
    %13 = vector.broadcast %12 : vector<1x128xf32> to vector<8x128xf32>
    %14 = arith.addf %11, %13 : vector<8x128xf32>
    %cst_11 = arith.constant 0.000000e+00 : f32
    %15 = vector.broadcast %cst_11 : f32 to vector<8x128xf32>
    %16 = arith.maximumf %14, %15 : vector<8x128xf32>
    %17 = arith.truncf %16 : vector<8x128xf32> to vector<8x128xbf16>
    %c0_12 = arith.constant 0 : index
    %c0_13 = arith.constant 0 : index
    %18 = vector.load %arg6[%c0_12, %c0_13] : memref<128x128xbf16, #tpu.memory_space<vmem>>, vector<128x128xbf16>
    %cst_14 = arith.constant dense<0.000000e+00> : vector<8x128xf32>
    %19 = tpu.matmul %17, %18, %cst_14 {dimension_numbers = #tpu.dot_dimension_numbers<[1], [0], [0], [1], [0, 0, 1, 1], [], []>} : vector<8x128xbf16>, vector<128x128xbf16>, vector<8x128xf32> -> vector<8x128xf32>
    %c0_15 = arith.constant 0 : index
    %c0_16 = arith.constant 0 : index
    %20 = vector.load %arg7[%c0_15, %c0_16] : memref<1x128xf32, #tpu.memory_space<vmem>>, vector<1x128xf32>
    %21 = vector.broadcast %20 : vector<1x128xf32> to vector<8x128xf32>
    %22 = arith.addf %19, %21 : vector<8x128xf32>
    %c0_17 = arith.constant 0 : index
    %c0_18 = arith.constant 0 : index
    %23 = vector.load %arg8[%c0_17, %c0_18] : memref<8x128xf32, #tpu.memory_space<vmem>>, vector<8x128xf32>
    tpu.vector_store %arg8[%c0_17, %c0_18], %22 {strides = array<i32>} : memref<8x128xf32, #tpu.memory_space<vmem>>, vector<8x128xf32>,
    return
  }
  func.func @transform_0(%arg0: i32) -> (i32, i32) {
    %c0_i32 = arith.constant 0 : i32
    %c0_i32_0 = arith.constant 0 : i32
    return %arg0, %c0_i32 : i32, i32
  }
  func.func @transform_1(%arg0: i32) -> (i32, i32) {
    %c0_i32 = arith.constant 0 : i32
    %c0_i32_0 = arith.constant 0 : i32
    %c0_i32_1 = arith.constant 0 : i32
    return %c0_i32, %c0_i32_0 : i32, i32
  }
  func.func @transform_2(%arg0: i32) -> (i32, i32) {
    %c0_i32 = arith.constant 0 : i32
    %c0_i32_0 = arith.constant 0 : i32
    %c0_i32_1 = arith.constant 0 : i32
    return %c0_i32, %c0_i32_0 : i32, i32
  }
  func.func @transform_3(%arg0: i32) -> (i32, i32) {
    %c0_i32 = arith.constant 0 : i32
    %c0_i32_0 = arith.constant 0 : i32
    %c0_i32_1 = arith.constant 0 : i32
    return %c0_i32, %c0_i32_0 : i32, i32
  }
  func.func @transform_4(%arg0: i32) -> (i32, i32) {
    %c0_i32 = arith.constant 0 : i32
    %c0_i32_0 = arith.constant 0 : i32
    %c0_i32_1 = arith.constant 0 : i32
    return %c0_i32, %c0_i32_0 : i32, i32
  }
  func.func @transform_5(%arg0: i32) -> (i32, i32) {
    %c0_i32 = arith.constant 0 : i32
    %c0_i32_0 = arith.constant 0 : i32
    %c0_i32_1 = arith.constant 0 : i32
    return %c0_i32, %c0_i32_0 : i32, i32
  }
  func.func @transform_6(%arg0: i32) -> (i32, i32) {
    %c0_i32 = arith.constant 0 : i32
    %c0_i32_0 = arith.constant 0 : i32
    %c0_i32_1 = arith.constant 0 : i32
    return %c0_i32, %c0_i32_0 : i32, i32
  }
  func.func @transform_7(%arg0: i32) -> (i32, i32) {
    %c0_i32 = arith.constant 0 : i32
    %c0_i32_0 = arith.constant 0 : i32
    return %arg0, %c0_i32 : i32, i32
  }
}

module attributes {stable_mosaic.version = 11 : i64} {
  func.func @mlp_kernel(%arg0: i32, %arg1: memref<8x64xf32, #tpu.memory_space<vmem>>, %arg2: memref<64x128xbf16, #tpu.memory_space<vmem>>, %arg3: memref<1x128xf32, #tpu.memory_space<vmem>>, %arg4: memref<128x128xbf16, #tpu.memory_space<vmem>>, %arg5: memref<1x128xf32, #tpu.memory_space<vmem>>, %arg6: memref<128x128xbf16, #tpu.memory_space<vmem>>, %arg7: memref<1x128xf32, #tpu.memory_space<vmem>>, %arg8: memref<8x128xf32, #tpu.memory_space<vmem>>) attributes {dimension_semantics = [#tpu.dimension_semantics<parallel>], iteration_bounds = array<i64: 1>, scalar_prefetch = 0 : i64, scratch_operands = 0 : i64, tpu.core_type = #tpu.core_type<tc>, window_params = [{transform_indices = @transform_0, window_bounds = array<i64: 8, 64>}, {pipeline_mode = #tpu.pipeline_mode<synchronous>, transform_indices = @transform_1, window_bounds = array<i64: 64, 128>}, {pipeline_mode = #tpu.pipeline_mode<synchronous>, transform_indices = @transform_2, window_bounds = array<i64: 1, 128>}, {pipeline_mode = #tpu.pipeline_mode<synchronous>, transform_indices = @transform_3, window_bounds = array<i64: 128, 128>}, {pipeline_mode = #tpu.pipeline_mode<synchronous>, transform_indices = @transform_4, window_bounds = array<i64: 1, 128>}, {pipeline_mode = #tpu.pipeline_mode<synchronous>, transform_indices = @transform_5, window_bounds = array<i64: 128, 128>}, {pipeline_mode = #tpu.pipeline_mode<synchronous>, transform_indices = @transform_6, window_bounds = array<i64: 1, 128>}, {transform_indices = @transform_7, window_bounds = array<i64: 8, 128>}]} {
    %c0 = arith.constant 0 : index
    %c0_0 = arith.constant 0 : index
    %0 = vector.load %arg1[%c0, %c0_0] : memref<8x64xf32, #tpu.memory_space<vmem>>, vector<8x64xf32>
    %1 = arith.truncf %0 : vector<8x64xf32> to vector<8x64xbf16>
    %c0_1 = arith.constant 0 : index
    %c0_2 = arith.constant 0 : index
    %2 = vector.load %arg2[%c0_1, %c0_2] : memref<64x128xbf16, #tpu.memory_space<vmem>>, vector<64x128xbf16>
    %cst = arith.constant dense<0.000000e+00> : vector<8x128xf32>
    %3 = tpu.matmul %1, %2, %cst {dimension_numbers = #tpu.dot_dimension_numbers<[1], [0], [0], [1], [0, 0, 1, 1], [], []>} : vector<8x64xbf16>, vector<64x128xbf16>, vector<8x128xf32> -> vector<8x128xf32>
    %c0_3 = arith.constant 0 : index
    %c0_4 = arith.constant 0 : index
    %4 = vector.load %arg3[%c0_3, %c0_4] : memref<1x128xf32, #tpu.memory_space<vmem>>, vector<1x128xf32>
    %5 = vector.broadcast %4 : vector<1x128xf32> to vector<8x128xf32>
    %6 = arith.addf %3, %5 : vector<8x128xf32>
    %cst_5 = arith.constant 0.000000e+00 : f32
    %7 = vector.broadcast %cst_5 : f32 to vector<8x128xf32>
    %8 = arith.maximumf %6, %7 : vector<8x128xf32>
    %9 = arith.truncf %8 : vector<8x128xf32> to vector<8x128xbf16>
    %c0_6 = arith.constant 0 : index
    %c0_7 = arith.constant 0 : index
    %10 = vector.load %arg4[%c0_6, %c0_7] : memref<128x128xbf16, #tpu.memory_space<vmem>>, vector<128x128xbf16>
    %cst_8 = arith.constant dense<0.000000e+00> : vector<8x128xf32>
    %11 = tpu.matmul %9, %10, %cst_8 {dimension_numbers = #tpu.dot_dimension_numbers<[1], [0], [0], [1], [0, 0, 1, 1], [], []>} : vector<8x128xbf16>, vector<128x128xbf16>, vector<8x128xf32> -> vector<8x128xf32>
    %c0_9 = arith.constant 0 : index
    %c0_10 = arith.constant 0 : index
    %12 = vector.load %arg5[%c0_9, %c0_10] : memref<1x128xf32, #tpu.memory_space<vmem>>, vector<1x128xf32>
    %13 = vector.broadcast %12 : vector<1x128xf32> to vector<8x128xf32>
    %14 = arith.addf %11, %13 : vector<8x128xf32>
    %cst_11 = arith.constant 0.000000e+00 : f32
    %15 = vector.broadcast %cst_11 : f32 to vector<8x128xf32>
    %16 = arith.maximumf %14, %15 : vector<8x128xf32>
    %17 = arith.truncf %16 : vector<8x128xf32> to vector<8x128xbf16>
    %c0_12 = arith.constant 0 : index
    %c0_13 = arith.constant 0 : index
    %18 = vector.load %arg6[%c0_12, %c0_13] : memref<128x128xbf16, #tpu.memory_space<vmem>>, vector<128x128xbf16>
    %cst_14 = arith.constant dense<0.000000e+00> : vector<8x128xf32>
    %19 = tpu.matmul %17, %18, %cst_14 {dimension_numbers = #tpu.dot_dimension_numbers<[1], [0], [0], [1], [0, 0, 1, 1], [], []>} : vector<8x128xbf16>, vector<128x128xbf16>, vector<8x128xf32> -> vector<8x128xf32>
    %c0_15 = arith.constant 0 : index
    %c0_16 = arith.constant 0 : index
    %20 = vector.load %arg7[%c0_15, %c0_16] : memref<1x128xf32, #tpu.memory_space<vmem>>, vector<1x128xf32>
    %21 = vector.broadcast %20 : vector<1x128xf32> to vector<8x128xf32>
    %22 = arith.addf %19, %21 : vector<8x128xf32>
    %c0_17 = arith.constant 0 : index
    %c0_18 = arith.constant 0 : index
    %23 = vector.load %arg8[%c0_17, %c0_18] : memref<8x128xf32, #tpu.memory_space<vmem>>, vector<8x128xf32>
    tpu.vector_store %arg8[%c0_17, %c0_18], %22 {strides = array<i32>} : memref<8x128xf32, #tpu.memory_space<vmem>>, vector<8x128xf32>,
    return
  }
  func.func @transform_0(%arg0: i32) -> (i32, i32) {
    %c0_i32 = arith.constant 0 : i32
    %c0_i32_0 = arith.constant 0 : i32
    return %arg0, %c0_i32 : i32, i32
  }
  func.func @transform_1(%arg0: i32) -> (i32, i32) {
    %c0_i32 = arith.constant 0 : i32
    %c0_i32_0 = arith.constant 0 : i32
    %c0_i32_1 = arith.constant 0 : i32
    return %c0_i32, %c0_i32_0 : i32, i32
  }
  func.func @transform_2(%arg0: i32) -> (i32, i32) {
    %c0_i32 = arith.constant 0 : i32
    %c0_i32_0 = arith.constant 0 : i32
    %c0_i32_1 = arith.constant 0 : i32
    return %c0_i32, %c0_i32_0 : i32, i32
  }
  func.func @transform_3(%arg0: i32) -> (i32, i32) {
    %c0_i32 = arith.constant 0 : i32
    %c0_i32_0 = arith.constant 0 : i32
    %c0_i32_1 = arith.constant 0 : i32
    return %c0_i32, %c0_i32_0 : i32, i32
  }
  func.func @transform_4(%arg0: i32) -> (i32, i32) {
    %c0_i32 = arith.constant 0 : i32
    %c0_i32_0 = arith.constant 0 : i32
    %c0_i32_1 = arith.constant 0 : i32
    return %c0_i32, %c0_i32_0 : i32, i32
  }
  func.func @transform_5(%arg0: i32) -> (i32, i32) {
    %c0_i32 = arith.constant 0 : i32
    %c0_i32_0 = arith.constant 0 : i32
    %c0_i32_1 = arith.constant 0 : i32
    return %c0_i32, %c0_i32_0 : i32, i32
  }
  func.func @transform_6(%arg0: i32) -> (i32, i32) {
    %c0_i32 = arith.constant 0 : i32
    %c0_i32_0 = arith.constant 0 : i32
    %c0_i32_1 = arith.constant 0 : i32
    return %c0_i32, %c0_i32_0 : i32, i32
  }
  func.func @transform_7(%arg0: i32) -> (i32, i32) {
    %c0_i32 = arith.constant 0 : i32
    %c0_i32_0 = arith.constant 0 : i32
    return %arg0, %c0_i32 : i32, i32
  }
}

</mosaic_0001>

<bundles_post_ra>
// kernel: tpu_custom_call.1
= control target key start
LH: loop header
LB: loop body
LE: loop exit
PB: predicated region body
PF: predicated region fallthrough
CT: control target
= control target key end

     0   :  { %12 = vsyncpa [#allocation3], 0  ;;  %s809_s0 = inlined_call_operand.hbm [shape: f32[8,64], index: 0, kind: input, shape index: {}]   ;;  %s810_s1 = inlined_call_operand.hbm [shape: bf16[64,128], index: 1, kind: input, shape index: {}]   ;;  %s811_s2 = inlined_call_operand.vmem [shape: f32[1,128], index: 2, kind: input, shape index: {}]   ;;  %s812_s3 = inlined_call_operand.hbm [shape: bf16[128,128], index: 3, kind: input, shape index: {}]   ;;  %s813_s4 = inlined_call_operand.vmem [shape: f32[1,128], index: 4, kind: input, shape index: {}]   ;;  %s814_s5 = inlined_call_operand.hbm [shape: bf16[128,128], index: 5, kind: input, shape index: {}]   ;;  %s815_s6 = inlined_call_operand.vmem [shape: f32[1,128], index: 6, kind: input, shape index: {}]   ;;  %s816_s7 = inlined_call_operand.hbm [shape: f32[8,128], index: 7, kind: output, shape index: {}]  }
   0x1   :  { %13 = vsyncpa [#allocation6], 0 }
   0x2   :  { %14 = vsyncpa [#allocation9], 0 }
   0x3   :  { %15 = vsyncpa [#allocation4], 0  ;;  %s656_s24 = smov [#allocation5]   ;;  %s538_s28 = scalar_lea.hbm %s810_s1, 512 }
   0x4   :  { %s31_s25 = sshll.u32 %s656_s24, 4  ;;  %p539_p0 = scmp.ne.s32.totalorder %s810_s1, %s538_s28  ;;  %s32_s25 = int_to_ptr.vmem [resolvable:$true] %s31_s25 }
   0x5   :  { %p542_p1 = scmp.lt.u32.totalorder %s538_s28, %s810_s1 }
   0x7   :  { %p544_p2 = pnand %p542_p1, %p539_p0 }
   0x9   :  { %547 = shalt.err (!%p544_p2)
}
   0xa   :  { %s548_s10 = scalar_lea.vmem %s32_s25, 512  ;;  %p553_p4 = scmp.lt.s32.totalorder %s32_s25, %s32_s25 }
   0xb   :  { %p549_p3 = scmp.ne.s32.totalorder %s32_s25, %s548_s10  ;;  %p554_p5 = scmp.lt.s32.totalorder %s548_s10, %s548_s10 }
   0xd   :  { %p555_p6 = por %p554_p5, %p553_p4 }
   0xf   :  { %p556_p7 = pnand %p555_p6, %p549_p3 }
  0x11   :  { %559 = shalt.err (!%p556_p7)
}
  0x12   :  { %s657_s11 = smov 64   ;;  %s658_s12 = smov 4  }
  0x13   :  { %37 = dma.hbm_to_vmem [thread:$0]  %s810_s1, 512, %s32_s25, [#allocation6], %s657_s11, %s657_s11, %s658_s12  }
  0x14   :  { %s659_s15 = smov [#allocation2]   ;;  %s660_s17 = smov [#allocation7]  }
  0x15   :  { %s22_s16 = sshll.u32 %s659_s15, 4  ;;  %s45_s18 = sshll.u32 %s660_s17, 4  ;;  %s23_s16 = int_to_ptr.vmem [resolvable:$true] %s22_s16  ;;  %s46_s18 = int_to_ptr.vmem [resolvable:$true] %s45_s18 }
  0x16   :  { %s560_s21 = scalar_lea.hbm %s809_s0, 128 }
  0x17   :  { %p561_p8 = scmp.ne.s32.totalorder %s809_s0, %s560_s21  ;;  %p564_p9 = scmp.lt.u32.totalorder %s560_s21, %s809_s0 }
  0x19   :  { %p566_p10 = pnand %p564_p9, %p561_p8 }
  0x1b   :  { %569 = shalt.err (!%p566_p10)
}
  0x1c   :  { %s570_s1 = scalar_lea.vmem %s23_s16, 128  ;;  %p575_p12 = scmp.lt.s32.totalorder %s23_s16, %s23_s16 }
  0x1d   :  { %p571_p11 = scmp.ne.s32.totalorder %s23_s16, %s570_s1  ;;  %p576_p13 = scmp.lt.s32.totalorder %s570_s1, %s570_s1 }
  0x1f   :  { %p577_p0 = por %p576_p13, %p575_p12 }
  0x21   :  { %p578_p1 = pnand %p577_p0, %p571_p11 }
  0x23   :  { %581 = shalt.err (!%p578_p1)
}
  0x24   :  { %25 = dma.hbm_to_vmem [thread:$0]  %s809_s0, 128, %s23_s16, [#allocation3]  }
  0x25   :  { %s582_s30 = scalar_lea.hbm %s812_s3, 1024 }
  0x26   :  { %p583_p2 = scmp.ne.s32.totalorder %s812_s3, %s582_s30  ;;  %p586_p3 = scmp.lt.u32.totalorder %s582_s30, %s812_s3 }
  0x28   :  { %p588_p4 = pnand %p586_p3, %p583_p2 }
  0x2a   :  { %591 = shalt.err (!%p588_p4)
}
  0x2b   :  { %s592_s14 = scalar_lea.vmem %s46_s18, 1024  ;;  %p597_p6 = scmp.lt.s32.totalorder %s46_s18, %s46_s18 }
  0x2c   :  { %p593_p5 = scmp.ne.s32.totalorder %s46_s18, %s592_s14  ;;  %p598_p7 = scmp.lt.s32.totalorder %s592_s14, %s592_s14 }
  0x2e   :  { %p599_p8 = por %p598_p7, %p597_p6 }
  0x30   :  { %p600_p9 = pnand %p599_p8, %p593_p5 }
  0x32   :  { %603 = shalt.err (!%p600_p9)
}
  0x33   :  { %51 = dma.hbm_to_vmem [thread:$0]  %s812_s3, 1024, %s46_s18, [#allocation6], %s657_s11, %s657_s11, %s658_s12  }
  0x34   :  { %s661_s16 = smov [#allocation8]   ;;  %s604_s21 = scalar_lea.hbm %s814_s5, 1024 }
  0x35   :  { %s59_s17 = sshll.u32 %s661_s16, 4  ;;  %p605_p10 = scmp.ne.s32.totalorder %s814_s5, %s604_s21  ;;  %s60_s17 = int_to_ptr.vmem [resolvable:$true] %s59_s17 }
  0x36   :  { %p608_p11 = scmp.lt.u32.totalorder %s604_s21, %s814_s5 }
  0x38   :  { %p610_p12 = pnand %p608_p11, %p605_p10 }
  0x3a   :  { %613 = shalt.err (!%p610_p12)
}
  0x3b   :  { %s614_s1 = scalar_lea.vmem %s60_s17, 1024  ;;  %p619_p0 = scmp.lt.s32.totalorder %s60_s17, %s60_s17 }
  0x3c   :  { %p615_p13 = scmp.ne.s32.totalorder %s60_s17, %s614_s1  ;;  %p620_p1 = scmp.lt.s32.totalorder %s614_s1, %s614_s1 }
  0x3e   :  { %p621_p2 = por %p620_p1, %p619_p0 }
  0x40   :  { %p622_p3 = pnand %p621_p2, %p615_p13 }
  0x42   :  { %625 = shalt.err (!%p622_p3)
}
  0x43   :  { %65 = dma.hbm_to_vmem [thread:$0]  %s814_s5, 1024, %s60_s17, [#allocation9], %s657_s11, %s657_s11, %s658_s12  }
  0x44   :  { %648 = dma.done.wait [#allocation3], 128  }
  0x45   :  { %649 = vsyncadd [#allocation3], 4294967168 }
  0x46   :  { %650 = dma.done.wait [#allocation6], 1536  }
  0x47   :  { %651 = vsyncadd [#allocation6], 4294965760 }
  0x48   :  { %652 = dma.done.wait [#allocation9], 1024  }
  0x49   :  { %653 = vsyncadd [#allocation9], 4294966272  ;;  %v662_v0 = vmov 0.0   ;;  %vm663_vm0 = vmmov 0   ;;  %v518_v1 = vld [vmem:[#allocation5] sm:$0xff]   ;;  %v519_v2 = vld [vmem:[#allocation5 + $0x8] sm:$0xff]  }
  0x4a   :  { %457 = vmatprep.subr.bf16.mxu0 %v662_v0  ;;  %465 = vmatprep.mubr.msk.bf16.mxu0 %vm663_vm0, %v662_v0  ;;  %v522_v3 = vld [vmem:[#allocation7] sm:$0xff]   ;;  %v520_v4 = vld [vmem:[#allocation5 + $0x10] sm:$0xff]   ;;  %v523_v5 = vld [vmem:[#allocation7 + $0x8] sm:$0xff]   ;;  %vm122_vm1 = vcmask 523264   ;;  %s664_s28 = smov [#allocation10]  }
  0x4b   :  { %469 = vmatprep.subr.bf16.mxu1 %v662_v0  ;;  %485 = vmatprep.mubr.msk.bf16.mxu1 %vm663_vm0, %v662_v0  ;;  %v521_v6 = vld [vmem:[#allocation5 + $0x18] sm:$0xff]   ;;  %v524_v8 = vld [vmem:[#allocation7 + $0x10] sm:$0xff]   ;;  %v526_v11 = vld [vmem:[#allocation7 + $0x20] sm:$0xff]   ;;  %s399_s29 = sshll.u32 %s664_s28, 4  ;;  %s400_s29 = int_to_ptr.vmem [resolvable:$true] %s399_s29 }
  0x4c   :  { %458 = vmatpush3.bf16.msra.mxu0 %v518_v1  ;;  %470 = vmatpush3.bf16.msra.mxu1 %v522_v3  ;;  %v81_v7 = vld [vmem:[#allocation2] sm:$0xff]  ;;  %v527_v12 = vld [vmem:[#allocation7 + $0x28] sm:$0xff]   ;;  %v528_v13 = vld [vmem:[#allocation7 + $0x30] sm:$0xff]   ;;  %p631_p5 = scmp.lt.s32.totalorder %s400_s29, %s400_s29 }
  0x4d   :  { %459 = vmatprep.subr.bf16.mxu0 %v662_v0  ;;  %471 = vmatprep.subr.bf16.mxu1 %v662_v0  ;;  %v82_v9 = vpack.c.bf16 %v81_v7, %v81_v7  ;;  %v525_v10 = vld [vmem:[#allocation7 + $0x18] sm:$0xff]   ;;  %v530_v15 = vld [vmem:[#allocation8] sm:$0xff]   ;;  %v531_v16 = vld [vmem:[#allocation8 + $0x8] sm:$0xff]  }
  0x4e   :  { %v529_v14 = vld [vmem:[#allocation7 + $0x38] sm:$0xff]   ;;  %v532_v17 = vld [vmem:[#allocation8 + $0x10] sm:$0xff]   ;;  %v534_v19 = vld [vmem:[#allocation8 + $0x20] sm:$0xff]  }
  0x4f   :  { %v533_v18 = vld [vmem:[#allocation8 + $0x18] sm:$0xff]   ;;  %v535_v20 = vld [vmem:[#allocation8 + $0x28] sm:$0xff]   ;;  %v536_v29 = vld [vmem:[#allocation8 + $0x30] sm:$0xff]  }
  0x50   :  { %460 = vmatpush3.bf16.msra.mxu0 %v519_v2  ;;  %472 = vmatpush3.bf16.msra.mxu1 %v523_v5  ;;  %v410_v21 = vld [vmem:[%s811_s2] ss:$0 sm:$0xff] }
  0x51   :  { %461 = vmatprep.subr.bf16.mxu0 %v662_v0  ;;  %473 = vmatprep.subr.bf16.mxu1 %v662_v0  ;;  %v537_v30 = vld [vmem:[#allocation8 + $0x38] sm:$0xff]  }
  0x52   :  { %v416_v31 = vld [vmem:[%s813_s4] ss:$0 sm:$0xff]  ;;  %s626_s4 = scalar_lea.vmem %s400_s29, 128 }
  0x53   :  { %v425_v39 = vld [vmem:[%s815_s6] ss:$0 sm:$0xff]  ;;  %p627_p4 = scmp.ne.s32.totalorder %s400_s29, %s626_s4  ;;  %p632_p6 = scmp.lt.s32.totalorder %s626_s4, %s626_s4 }
  0x54   :  { %462 = vmatpush3.bf16.msra.mxu0 %v520_v4  ;;  %474 = vmatpush3.bf16.msra.mxu1 %v524_v8 }
  0x55   :  { %463 = vmatprep.subr.bf16.mxu0 %v662_v0  ;;  %475 = vmatprep.subr.bf16.mxu1 %v662_v0  ;;  %p633_p7 = por %p632_p6, %p631_p5 }
  0x57   :  { %p634_p8 = pnand %p633_p7, %p627_p4 }
  0x58   :  { %464 = vmatpush3.bf16.msra.mxu0 %v521_v6  ;;  %476 = vmatpush3.bf16.msra.mxu1 %v525_v10 }
  0x59   :  { %489 = vmatprep.subr.bf16.mxu0 %v662_v0  ;;  %477 = vmatprep.subr.bf16.mxu1 %v662_v0 }
  0x5b   :  { %466 = vmatmul.mubr.msk.bf16.vlgmr.msra.gmra.mrb[0].mxu0 %vm122_vm1, %v82_v9 }
  0x5c   :  { %505 = vmatprep.mubr.msk.bf16.mxu0 %vm663_vm0, %v662_v0  ;;  %478 = vmatpush3.bf16.msra.mxu1 %v526_v11 }
  0x5d   :  { %479 = vmatprep.subr.bf16.mxu1 %v662_v0  ;;  %490 = vmatpush3.bf16.msra.mxu0 %v530_v15 }
  0x5e   :  { %491 = vmatprep.subr.bf16.mxu0 %v662_v0 }
  0x60   :  { %480 = vmatpush3.bf16.msra.mxu1 %v527_v12 }
  0x61   :  { %481 = vmatprep.subr.bf16.mxu1 %v662_v0  ;;  %492 = vmatpush3.bf16.msra.mxu0 %v531_v16 }
  0x62   :  { %493 = vmatprep.subr.bf16.mxu0 %v662_v0 }
  0x64   :  { %482 = vmatpush3.bf16.msra.mxu1 %v528_v13 }
  0x65   :  { %483 = vmatprep.subr.bf16.mxu1 %v662_v0  ;;  %494 = vmatpush3.bf16.msra.mxu0 %v532_v17 }
  0x66   :  { %495 = vmatprep.subr.bf16.mxu0 %v662_v0 }
  0x68   :  { %484 = vmatpush3.bf16.msra.mxu1 %v529_v14 }
  0x69   :  { %496 = vmatpush3.bf16.msra.mxu0 %v533_v18 }
  0x6a   :  { %497 = vmatprep.subr.bf16.mxu0 %v662_v0 }
  0x6d   :  { %498 = vmatpush3.bf16.msra.mxu0 %v534_v19 }
  0x6e   :  { %499 = vmatprep.subr.bf16.mxu0 %v662_v0 }
  0x71   :  { %500 = vmatpush3.bf16.msra.mxu0 %v535_v20 }
  0x72   :  { %501 = vmatprep.subr.bf16.mxu0 %v662_v0 }
  0x75   :  { %502 = vmatpush3.bf16.msra.mxu0 %v536_v29 }
  0x76   :  { %503 = vmatprep.subr.bf16.mxu0 %v662_v0 }
  0x79   :  { %504 = vmatpush3.bf16.msra.mxu0 %v537_v30 }
 0x12e   :  { %v160_v22 = vpop.f32.mrb[0].mxu0 }
 0x12f   :  { %v161_v23 = vadd.f32 %v410_v21, %v160_v22  ;;  %v467_v24 = vpop.f32.mrb[1].mxu0 }
 0x130   :  { %v163_v25 = vpop.f32.mrb[2].mxu0 }
 0x131   :  { %v166_v26 = vmax.f32 %v161_v23, 0.0  ;;  %v468_v27 = vpop.f32.mrb[3].mxu0 }
 0x133   :  { %v167_v28 = vpack.c.bf16 %v166_v26, %v166_v26 }
 0x135   :  { %486 = vmatmul.mubr.bf16.vlgmr.msra.gmra.mrb[0].mxu1 %v167_v28 }
 0x208   :  { %v273_v32 = vpop.f32.mrb[0].mxu1 }
 0x209   :  { %v274_v33 = vadd.f32 %v416_v31, %v273_v32  ;;  %v487_v34 = vpop.f32.mrb[1].mxu1 }
 0x20a   :  { %v276_v35 = vpop.f32.mrb[2].mxu1 }
 0x20b   :  { %v279_v36 = vmax.f32 %v274_v33, 0.0  ;;  %v488_v37 = vpop.f32.mrb[3].mxu1 }
 0x20d   :  { %v280_v38 = vpack.c.bf16 %v279_v36, %v279_v36 }
 0x20f   :  { %506 = vmatmul.mubr.bf16.vlgmr.msra.gmra.mrb[4].mxu0 %v280_v38 }
 0x2e2   :  { %v386_v40 = vpop.f32.mrb[4].mxu0 }
 0x2e3   :  { %v387_v41 = vadd.f32 %v425_v39, %v386_v40  ;;  %v507_v42 = vpop.f32.mrb[5].mxu0 }
 0x2e4   :  { %v389_v43 = vpop.f32.mrb[6].mxu0 }
 0x2e5   :  { %392 = vst [vmem:[#allocation10] sm:$0xff] %v387_v41  ;;  %v508_v44 = vpop.f32.mrb[7].mxu0 }
 0x2e6   :  { %637 = shalt.err (!%p634_p8)
}
 0x2e7   :  { %s638_s6 = scalar_lea.hbm %s816_s7, 128 }
 0x2e8   :  { %p639_p9 = scmp.ne.s32.totalorder %s816_s7, %s638_s6  ;;  %p642_p10 = scmp.lt.u32.totalorder %s638_s6, %s816_s7 }
 0x2ea   :  { %p644_p11 = pnand %p642_p10, %p639_p9 }
 0x2ec   :  { %647 = shalt.err (!%p644_p11)
}
 0x2ed   :  { %402 = dma.vmem_to_hbm [thread:$0]  %s400_s29, 128, %s816_s7, [#allocation4]  }
 0x2ee   :  { %654 = dma.done.wait [#allocation4], 128  }
 0x2ef   :  { %655 = vsyncadd [#allocation4], 4294967168 }
 0x2f0   :  { %406 = vsyncpa [#allocation3], 1 }
 0x2f1   :  { %407 = vsyncpa [#allocation6], 1 }
 0x2f2   :  { %408 = vsyncpa [#allocation9], 1 }
 0x2f3   :  { %409 = vsyncpa [#allocation4], 1 }

// kernel: tpu_custom_call.1
= control target key start
LH: loop header
LB: loop body
LE: loop exit
PB: predicated region body
PF: predicated region fallthrough
CT: control target
= control target key end

     0   :  { %12 = vsyncpa [#allocation3], 0  ;;  %s809_s0 = inlined_call_operand.hbm [shape: f32[8,64], index: 0, kind: input, shape index: {}]   ;;  %s810_s1 = inlined_call_operand.hbm [shape: bf16[64,128], index: 1, kind: input, shape index: {}]   ;;  %s811_s2 = inlined_call_operand.vmem [shape: f32[1,128], index: 2, kind: input, shape index: {}]   ;;  %s812_s3 = inlined_call_operand.hbm [shape: bf16[128,128], index: 3, kind: input, shape index: {}]   ;;  %s813_s4 = inlined_call_operand.vmem [shape: f32[1,128], index: 4, kind: input, shape index: {}]   ;;  %s814_s5 = inlined_call_operand.hbm [shape: bf16[128,128], index: 5, kind: input, shape index: {}]   ;;  %s815_s6 = inlined_call_operand.vmem [shape: f32[1,128], index: 6, kind: input, shape index: {}]   ;;  %s816_s7 = inlined_call_operand.hbm [shape: f32[8,128], index: 7, kind: output, shape index: {}]  }
   0x1   :  { %13 = vsyncpa [#allocation6], 0 }
   0x2   :  { %14 = vsyncpa [#allocation9], 0 }
   0x3   :  { %15 = vsyncpa [#allocation4], 0  ;;  %s656_s24 = smov [#allocation5]   ;;  %s538_s28 = scalar_lea.hbm %s810_s1, 512 }
   0x4   :  { %s31_s25 = sshll.u32 %s656_s24, 4  ;;  %p539_p0 = scmp.ne.s32.totalorder %s810_s1, %s538_s28  ;;  %s32_s25 = int_to_ptr.vmem [resolvable:$true] %s31_s25 }
   0x5   :  { %p542_p1 = scmp.lt.u32.totalorder %s538_s28, %s810_s1 }
   0x7   :  { %p544_p2 = pnand %p542_p1, %p539_p0 }
   0x9   :  { %547 = shalt.err (!%p544_p2)
}
   0xa   :  { %s548_s10 = scalar_lea.vmem %s32_s25, 512  ;;  %p553_p4 = scmp.lt.s32.totalorder %s32_s25, %s32_s25 }
   0xb   :  { %p549_p3 = scmp.ne.s32.totalorder %s32_s25, %s548_s10  ;;  %p554_p5 = scmp.lt.s32.totalorder %s548_s10, %s548_s10 }
   0xd   :  { %p555_p6 = por %p554_p5, %p553_p4 }
   0xf   :  { %p556_p7 = pnand %p555_p6, %p549_p3 }
  0x11   :  { %559 = shalt.err (!%p556_p7)
}
  0x12   :  { %s657_s11 = smov 64   ;;  %s658_s12 = smov 4  }
  0x13   :  { %37 = dma.hbm_to_vmem [thread:$0]  %s810_s1, 512, %s32_s25, [#allocation6], %s657_s11, %s657_s11, %s658_s12  }
  0x14   :  { %s659_s15 = smov [#allocation2]   ;;  %s660_s17 = smov [#allocation7]  }
  0x15   :  { %s22_s16 = sshll.u32 %s659_s15, 4  ;;  %s45_s18 = sshll.u32 %s660_s17, 4  ;;  %s23_s16 = int_to_ptr.vmem [resolvable:$true] %s22_s16  ;;  %s46_s18 = int_to_ptr.vmem [resolvable:$true] %s45_s18 }
  0x16   :  { %s560_s21 = scalar_lea.hbm %s809_s0, 128 }
  0x17   :  { %p561_p8 = scmp.ne.s32.totalorder %s809_s0, %s560_s21  ;;  %p564_p9 = scmp.lt.u32.totalorder %s560_s21, %s809_s0 }
  0x19   :  { %p566_p10 = pnand %p564_p9, %p561_p8 }
  0x1b   :  { %569 = shalt.err (!%p566_p10)
}
  0x1c   :  { %s570_s1 = scalar_lea.vmem %s23_s16, 128  ;;  %p575_p12 = scmp.lt.s32.totalorder %s23_s16, %s23_s16 }
  0x1d   :  { %p571_p11 = scmp.ne.s32.totalorder %s23_s16, %s570_s1  ;;  %p576_p13 = scmp.lt.s32.totalorder %s570_s1, %s570_s1 }
  0x1f   :  { %p577_p0 = por %p576_p13, %p575_p12 }
  0x21   :  { %p578_p1 = pnand %p577_p0, %p571_p11 }
  0x23   :  { %581 = shalt.err (!%p578_p1)
}
  0x24   :  { %25 = dma.hbm_to_vmem [thread:$0]  %s809_s0, 128, %s23_s16, [#allocation3]  }
  0x25   :  { %s582_s30 = scalar_lea.hbm %s812_s3, 1024 }
  0x26   :  { %p583_p2 = scmp.ne.s32.totalorder %s812_s3, %s582_s30  ;;  %p586_p3 = scmp.lt.u32.totalorder %s582_s30, %s812_s3 }
  0x28   :  { %p588_p4 = pnand %p586_p3, %p583_p2 }
  0x2a   :  { %591 = shalt.err (!%p588_p4)
}
  0x2b   :  { %s592_s14 = scalar_lea.vmem %s46_s18, 1024  ;;  %p597_p6 = scmp.lt.s32.totalorder %s46_s18, %s46_s18 }
  0x2c   :  { %p593_p5 = scmp.ne.s32.totalorder %s46_s18, %s592_s14  ;;  %p598_p7 = scmp.lt.s32.totalorder %s592_s14, %s592_s14 }
  0x2e   :  { %p599_p8 = por %p598_p7, %p597_p6 }
  0x30   :  { %p600_p9 = pnand %p599_p8, %p593_p5 }
  0x32   :  { %603 = shalt.err (!%p600_p9)
}
  0x33   :  { %51 = dma.hbm_to_vmem [thread:$0]  %s812_s3, 1024, %s46_s18, [#allocation6], %s657_s11, %s657_s11, %s658_s12  }
  0x34   :  { %s661_s16 = smov [#allocation8]   ;;  %s604_s21 = scalar_lea.hbm %s814_s5, 1024 }
  0x35   :  { %s59_s17 = sshll.u32 %s661_s16, 4  ;;  %p605_p10 = scmp.ne.s32.totalorder %s814_s5, %s604_s21  ;;  %s60_s17 = int_to_ptr.vmem [resolvable:$true] %s59_s17 }
  0x36   :  { %p608_p11 = scmp.lt.u32.totalorder %s604_s21, %s814_s5 }
  0x38   :  { %p610_p12 = pnand %p608_p11, %p605_p10 }
  0x3a   :  { %613 = shalt.err (!%p610_p12)
}
  0x3b   :  { %s614_s1 = scalar_lea.vmem %s60_s17, 1024  ;;  %p619_p0 = scmp.lt.s32.totalorder %s60_s17, %s60_s17 }
  0x3c   :  { %p615_p13 = scmp.ne.s32.totalorder %s60_s17, %s614_s1  ;;  %p620_p1 = scmp.lt.s32.totalorder %s614_s1, %s614_s1 }
  0x3e   :  { %p621_p2 = por %p620_p1, %p619_p0 }
  0x40   :  { %p622_p3 = pnand %p621_p2, %p615_p13 }
  0x42   :  { %625 = shalt.err (!%p622_p3)
}
  0x43   :  { %65 = dma.hbm_to_vmem [thread:$0]  %s814_s5, 1024, %s60_s17, [#allocation9], %s657_s11, %s657_s11, %s658_s12  }
  0x44   :  { %648 = dma.done.wait [#allocation3], 128  }
  0x45   :  { %649 = vsyncadd [#allocation3], 4294967168 }
  0x46   :  { %650 = dma.done.wait [#allocation6], 1536  }
  0x47   :  { %651 = vsyncadd [#allocation6], 4294965760 }
  0x48   :  { %652 = dma.done.wait [#allocation9], 1024  }
  0x49   :  { %653 = vsyncadd [#allocation9], 4294966272  ;;  %v662_v0 = vmov 0.0   ;;  %vm663_vm0 = vmmov 0   ;;  %v518_v1 = vld [vmem:[#allocation5] sm:$0xff]   ;;  %v519_v2 = vld [vmem:[#allocation5 + $0x8] sm:$0xff]  }
  0x4a   :  { %457 = vmatprep.subr.bf16.mxu0 %v662_v0  ;;  %465 = vmatprep.mubr.msk.bf16.mxu0 %vm663_vm0, %v662_v0  ;;  %v522_v3 = vld [vmem:[#allocation7] sm:$0xff]   ;;  %v520_v4 = vld [vmem:[#allocation5 + $0x10] sm:$0xff]   ;;  %v523_v5 = vld [vmem:[#allocation7 + $0x8] sm:$0xff]   ;;  %vm122_vm1 = vcmask 523264   ;;  %s664_s28 = smov [#allocation10]  }
  0x4b   :  { %469 = vmatprep.subr.bf16.mxu1 %v662_v0  ;;  %485 = vmatprep.mubr.msk.bf16.mxu1 %vm663_vm0, %v662_v0  ;;  %v521_v6 = vld [vmem:[#allocation5 + $0x18] sm:$0xff]   ;;  %v524_v8 = vld [vmem:[#allocation7 + $0x10] sm:$0xff]   ;;  %v526_v11 = vld [vmem:[#allocation7 + $0x20] sm:$0xff]   ;;  %s399_s29 = sshll.u32 %s664_s28, 4  ;;  %s400_s29 = int_to_ptr.vmem [resolvable:$true] %s399_s29 }
  0x4c   :  { %458 = vmatpush3.bf16.msra.mxu0 %v518_v1  ;;  %470 = vmatpush3.bf16.msra.mxu1 %v522_v3  ;;  %v81_v7 = vld [vmem:[#allocation2] sm:$0xff]  ;;  %v527_v12 = vld [vmem:[#allocation7 + $0x28] sm:$0xff]   ;;  %v528_v13 = vld [vmem:[#allocation7 + $0x30] sm:$0xff]   ;;  %p631_p5 = scmp.lt.s32.totalorder %s400_s29, %s400_s29 }
  0x4d   :  { %459 = vmatprep.subr.bf16.mxu0 %v662_v0  ;;  %471 = vmatprep.subr.bf16.mxu1 %v662_v0  ;;  %v82_v9 = vpack.c.bf16 %v81_v7, %v81_v7  ;;  %v525_v10 = vld [vmem:[#allocation7 + $0x18] sm:$0xff]   ;;  %v530_v15 = vld [vmem:[#allocation8] sm:$0xff]   ;;  %v531_v16 = vld [vmem:[#allocation8 + $0x8] sm:$0xff]  }
  0x4e   :  { %v529_v14 = vld [vmem:[#allocation7 + $0x38] sm:$0xff]   ;;  %v532_v17 = vld [vmem:[#allocation8 + $0x10] sm:$0xff]   ;;  %v534_v19 = vld [vmem:[#allocation8 + $0x20] sm:$0xff]  }
  0x4f   :  { %v533_v18 = vld [vmem:[#allocation8 + $0x18] sm:$0xff]   ;;  %v535_v20 = vld [vmem:[#allocation8 + $0x28] sm:$0xff]   ;;  %v536_v29 = vld [vmem:[#allocation8 + $0x30] sm:$0xff]  }
  0x50   :  { %460 = vmatpush3.bf16.msra.mxu0 %v519_v2  ;;  %472 = vmatpush3.bf16.msra.mxu1 %v523_v5  ;;  %v410_v21 = vld [vmem:[%s811_s2] ss:$0 sm:$0xff] }
  0x51   :  { %461 = vmatprep.subr.bf16.mxu0 %v662_v0  ;;  %473 = vmatprep.subr.bf16.mxu1 %v662_v0  ;;  %v537_v30 = vld [vmem:[#allocation8 + $0x38] sm:$0xff]  }
  0x52   :  { %v416_v31 = vld [vmem:[%s813_s4] ss:$0 sm:$0xff]  ;;  %s626_s4 = scalar_lea.vmem %s400_s29, 128 }
  0x53   :  { %v425_v39 = vld [vmem:[%s815_s6] ss:$0 sm:$0xff]  ;;  %p627_p4 = scmp.ne.s32.totalorder %s400_s29, %s626_s4  ;;  %p632_p6 = scmp.lt.s32.totalorder %s626_s4, %s626_s4 }
  0x54   :  { %462 = vmatpush3.bf16.msra.mxu0 %v520_v4  ;;  %474 = vmatpush3.bf16.msra.mxu1 %v524_v8 }
  0x55   :  { %463 = vmatprep.subr.bf16.mxu0 %v662_v0  ;;  %475 = vmatprep.subr.bf16.mxu1 %v662_v0  ;;  %p633_p7 = por %p632_p6, %p631_p5 }
  0x57   :  { %p634_p8 = pnand %p633_p7, %p627_p4 }
  0x58   :  { %464 = vmatpush3.bf16.msra.mxu0 %v521_v6  ;;  %476 = vmatpush3.bf16.msra.mxu1 %v525_v10 }
  0x59   :  { %489 = vmatprep.subr.bf16.mxu0 %v662_v0  ;;  %477 = vmatprep.subr.bf16.mxu1 %v662_v0 }
  0x5b   :  { %466 = vmatmul.mubr.msk.bf16.vlgmr.msra.gmra.mrb[0].mxu0 %vm122_vm1, %v82_v9 }
  0x5c   :  { %505 = vmatprep.mubr.msk.bf16.mxu0 %vm663_vm0, %v662_v0  ;;  %478 = vmatpush3.bf16.msra.mxu1 %v526_v11 }
  0x5d   :  { %479 = vmatprep.subr.bf16.mxu1 %v662_v0  ;;  %490 = vmatpush3.bf16.msra.mxu0 %v530_v15 }
  0x5e   :  { %491 = vmatprep.subr.bf16.mxu0 %v662_v0 }
  0x60   :  { %480 = vmatpush3.bf16.msra.mxu1 %v527_v12 }
  0x61   :  { %481 = vmatprep.subr.bf16.mxu1 %v662_v0  ;;  %492 = vmatpush3.bf16.msra.mxu0 %v531_v16 }
  0x62   :  { %493 = vmatprep.subr.bf16.mxu0 %v662_v0 }
  0x64   :  { %482 = vmatpush3.bf16.msra.mxu1 %v528_v13 }
  0x65   :  { %483 = vmatprep.subr.bf16.mxu1 %v662_v0  ;;  %494 = vmatpush3.bf16.msra.mxu0 %v532_v17 }
  0x66   :  { %495 = vmatprep.subr.bf16.mxu0 %v662_v0 }
  0x68   :  { %484 = vmatpush3.bf16.msra.mxu1 %v529_v14 }
  0x69   :  { %496 = vmatpush3.bf16.msra.mxu0 %v533_v18 }
  0x6a   :  { %497 = vmatprep.subr.bf16.mxu0 %v662_v0 }
  0x6d   :  { %498 = vmatpush3.bf16.msra.mxu0 %v534_v19 }
  0x6e   :  { %499 = vmatprep.subr.bf16.mxu0 %v662_v0 }
  0x71   :  { %500 = vmatpush3.bf16.msra.mxu0 %v535_v20 }
  0x72   :  { %501 = vmatprep.subr.bf16.mxu0 %v662_v0 }
  0x75   :  { %502 = vmatpush3.bf16.msra.mxu0 %v536_v29 }
  0x76   :  { %503 = vmatprep.subr.bf16.mxu0 %v662_v0 }
  0x79   :  { %504 = vmatpush3.bf16.msra.mxu0 %v537_v30 }
 0x12e   :  { %v160_v22 = vpop.f32.mrb[0].mxu0 }
 0x12f   :  { %v161_v23 = vadd.f32 %v410_v21, %v160_v22  ;;  %v467_v24 = vpop.f32.mrb[1].mxu0 }
 0x130   :  { %v163_v25 = vpop.f32.mrb[2].mxu0 }
 0x131   :  { %v166_v26 = vmax.f32 %v161_v23, 0.0  ;;  %v468_v27 = vpop.f32.mrb[3].mxu0 }
 0x133   :  { %v167_v28 = vpack.c.bf16 %v166_v26, %v166_v26 }
 0x135   :  { %486 = vmatmul.mubr.bf16.vlgmr.msra.gmra.mrb[0].mxu1 %v167_v28 }
 0x208   :  { %v273_v32 = vpop.f32.mrb[0].mxu1 }
 0x209   :  { %v274_v33 = vadd.f32 %v416_v31, %v273_v32  ;;  %v487_v34 = vpop.f32.mrb[1].mxu1 }
 0x20a   :  { %v276_v35 = vpop.f32.mrb[2].mxu1 }
 0x20b   :  { %v279_v36 = vmax.f32 %v274_v33, 0.0  ;;  %v488_v37 = vpop.f32.mrb[3].mxu1 }
 0x20d   :  { %v280_v38 = vpack.c.bf16 %v279_v36, %v279_v36 }
 0x20f   :  { %506 = vmatmul.mubr.bf16.vlgmr.msra.gmra.mrb[4].mxu0 %v280_v38 }
 0x2e2   :  { %v386_v40 = vpop.f32.mrb[4].mxu0 }
 0x2e3   :  { %v387_v41 = vadd.f32 %v425_v39, %v386_v40  ;;  %v507_v42 = vpop.f32.mrb[5].mxu0 }
 0x2e4   :  { %v389_v43 = vpop.f32.mrb[6].mxu0 }
 0x2e5   :  { %392 = vst [vmem:[#allocation10] sm:$0xff] %v387_v41  ;;  %v508_v44 = vpop.f32.mrb[7].mxu0 }
 0x2e6   :  { %637 = shalt.err (!%p634_p8)
}
 0x2e7   :  { %s638_s6 = scalar_lea.hbm %s816_s7, 128 }
 0x2e8   :  { %p639_p9 = scmp.ne.s32.totalorder %s816_s7, %s638_s6  ;;  %p642_p10 = scmp.lt.u32.totalorder %s638_s6, %s816_s7 }
 0x2ea   :  { %p644_p11 = pnand %p642_p10, %p639_p9 }
 0x2ec   :  { %647 = shalt.err (!%p644_p11)
}
 0x2ed   :  { %402 = dma.vmem_to_hbm [thread:$0]  %s400_s29, 128, %s816_s7, [#allocation4]  }
 0x2ee   :  { %654 = dma.done.wait [#allocation4], 128  }
 0x2ef   :  { %655 = vsyncadd [#allocation4], 4294967168 }
 0x2f0   :  { %406 = vsyncpa [#allocation3], 1 }
 0x2f1   :  { %407 = vsyncpa [#allocation6], 1 }
 0x2f2   :  { %408 = vsyncpa [#allocation9], 1 }
 0x2f3   :  { %409 = vsyncpa [#allocation4], 1 }

</bundles_post_ra>
